<compile_context>
chip_gen: v7x
topology: tpu7x:2x2x1
jax: 0.10.0
libtpu: 0.0.40
codegen_flags: <defaults>
</compile_context>

<pallas_src>
import functools
from math import sqrt

import jax
import jax.numpy as jnp
from jax.experimental import pallas as pl
from jax.experimental.pallas import tpu as pltpu


def _round_up(x, m):
    return ((x + m - 1) // m) * m


def _vmem_capacity_bytes():
    try:
        info = pltpu.get_tpu_info()
        cap = getattr(info, "vmem_capacity_bytes", None)
        if cap:
            return int(cap)
    except Exception:
        pass
    return 64 * 1024 * 1024  # conservative default (v7x per-TensorCore)


def _vmem_bytes_estimate(Bt, S, Ein, Ep, H, csize):
    x_tile = 2 * Bt * S * Ein * csize                 # double-buffered input
    out_tile = 2 * Bt * Ep * 4                        # double-buffered f32 output
    weights = 2 * ((3 * Ein * Ep + Ep * Ep + 2 * Ep * H) * csize + 4 * Ep * 4)
    live = 6 * Bt * S * Ep * 4                        # k, v, p, wp, scores (+slack)
    return x_tile + out_tile + weights + live


def _auto_batch_block(B, S, Ein, Ep, H, csize, vmem_capacity):
    """Largest sublane-aligned divisor of B giving >=2 grid steps within budget."""
    budget = int(0.45 * vmem_capacity)
    cands = [bt for bt in range(8, B, 8) if B % bt == 0 and B // bt >= 2]
    for bt in sorted(cands, reverse=True):
        if _vmem_bytes_estimate(bt, S, Ein, Ep, H, csize) <= budget:
            return bt
    if cands:
        return min(cands)
    return B


def _mha_last_kernel(x_ref, wq_ref, bq_ref, wk_ref, bk_ref, wv_ref, bv_ref,
                     sel_ref, selT_ref, wo_ref, bo_ref, out_ref,
                     *, compute_dtype):
    """One grid step: `Bt` batch elements, all heads, output projection.

    x_ref       : (Bt, S, Ein)  hidden-state tile (compute_dtype)
    wq/wk/wv    : (Ein, Ep)     head-packed projection weights (in, out);
                                Wq/bq have 1/sqrt(Dh) pre-folded; lanes padded.
    bq/bk/bv    : (1, Ep)       head-packed biases (f32)
    sel_ref     : (Ep, H)       sel[d,h]=1 iff packed dim d belongs to head h
    selT_ref    : (H, Ep)       transpose of sel
    wo_ref      : (Ep, Ep)      output projection weight (in, out), zero padded
    bo_ref      : (1, Ep)       output projection bias (f32), zero padded
    out_ref     : (Bt, Ep)      attention output at the LAST sequence position
    """
    Bt, S, Ein = x_ref.shape
    Ep = wk_ref.shape[1]
    H = sel_ref.shape[1]

    x = x_ref[...]                                   # (Bt, S, Ein) compute_dtype
    x2 = x.reshape(Bt * S, Ein)

    # Dense head-packed K / V projections for every position (MXU, f32 acc),
    # then cast to compute_dtype to halve the live intermediate footprint.
    k = jnp.dot(x2, wk_ref[...], preferred_element_type=jnp.float32) + bk_ref[...]
    v = jnp.dot(x2, wv_ref[...], preferred_element_type=jnp.float32) + bv_ref[...]
    k = k.astype(compute_dtype).reshape(Bt, S, Ep)
    v = v.astype(compute_dtype).reshape(Bt, S, Ep)

    # Q only for the last sequence position (1/sqrt(Dh) already folded in).
    x_last = x[:, S - 1, :]                          # (Bt, Ein)
    q = jnp.dot(x_last, wq_ref[...], preferred_element_type=jnp.float32) + bq_ref[...]
    q = q.astype(compute_dtype)                      # (Bt, Ep)

    # Scores for ALL heads at once:
    #   p[b,t,d] = q[b,d] * k[b,t,d]   (VPU, broadcast over S)
    #   s[b,t,h] = sum_{d in head h} p[b,t,d]   via one [Bt*S,Ep]x[Ep,H] matmul
    p = (q[:, None, :] * k).reshape(Bt * S, Ep)
    s = jnp.dot(p, sel_ref[...], preferred_element_type=jnp.float32)
    s = s.reshape(Bt, S, H)                          # (Bt, S, H) f32

    # Stable softmax over the sequence (sublane) axis, per head lane.
    m = jnp.max(s, axis=1, keepdims=True)
    e = jnp.exp(s - m)
    l = jnp.sum(e, axis=1, keepdims=True)
    w = e * pl.reciprocal(l, approx=True)            # (Bt, S, H) f32

    # Broadcast per-head weights back to packed lanes ([Bt*S,H]x[H,Ep] matmul),
    # then reduce over S: ctx[b,d] = sum_t w[b,t,h(d)] * v[b,t,d].
    wp = jnp.dot(w.reshape(Bt * S, H).astype(compute_dtype), selT_ref[...],
                 preferred_element_type=jnp.float32).reshape(Bt, S, Ep)
    ctx = jnp.sum(wp * v, axis=1)                    # (Bt, Ep) f32

    # Single dense output projection for the whole tile (lane-dense store).
    out = jnp.dot(ctx.astype(compute_dtype), wo_ref[...],
                  preferred_element_type=jnp.float32) + bo_ref[...]
    out_ref[...] = out.astype(out_ref.dtype)


def multi_head_attention(x, wq, bq, wk, bk, wv, bv, wo, bo,
                         *, compute_dtype=jnp.bfloat16, batch_block=None):
    """Pallas forward of MultiHeadAttention.

    x           : [B, S, E]  hidden state
    wq/wk/wv    : [H, E, Dh] per-head projection weights, (in, out) orientation
    bq/bk/bv    : [H, 1, Dh] per-head biases
    wo          : [E, E]     output projection weight, (in, out) orientation
    bo          : [1, E]     output projection bias
    returns     : [B, E]  == output_linear(concat_heads)[:, -1, :]
    """
    B, S, E = x.shape
    H, E_in, Dh = wq.shape
    assert E_in == E and H * Dh == E

    csize = jnp.dtype(compute_dtype).itemsize
    Ep = _round_up(E, 128)                  # lane-dense packed / output width
    scale = 1.0 / sqrt(Dh)

    # Head-major packing: column block h of the packed matrix == head h weights.
    def pack_w(w, pre_scale=1.0):
        wp = (jnp.transpose(w, (1, 0, 2)).reshape(E, E) * pre_scale)
        if Ep != E:
            wp = jnp.pad(wp, ((0, 0), (0, Ep - E)))
        return wp.astype(compute_dtype)

    def pack_b(b, pre_scale=1.0):
        bp = b.reshape(1, E).astype(jnp.float32) * pre_scale
        if Ep != E:
            bp = jnp.pad(bp, ((0, 0), (0, Ep - E)))
        return bp

    wq_p = pack_w(wq, scale)                # fold 1/sqrt(Dh) into Q weights
    bq_p = pack_b(bq, scale)                # ... and bias (f32)
    wk_p = pack_w(wk)
    bk_p = pack_b(bk)
    wv_p = pack_w(wv)
    bv_p = pack_b(bv)

    wo_p = wo if Ep == E else jnp.pad(wo, ((0, Ep - E), (0, Ep - E)))
    wo_p = wo_p.astype(compute_dtype)
    bo_p = bo.reshape(1, E).astype(jnp.float32)
    if Ep != E:
        bo_p = jnp.pad(bo_p, ((0, 0), (0, Ep - E)))

    # Head-selector matrices (exact 0/1 values, also exact in bf16).
    d_idx = jnp.arange(Ep)
    sel = ((d_idx[:, None] // Dh == jnp.arange(H)[None, :])
           & (d_idx[:, None] < E)).astype(compute_dtype)      # (Ep, H)
    selT = sel.T                                              # (H, Ep)

    cap = _vmem_capacity_bytes()
    if batch_block is None:
        Bt = _auto_batch_block(B, S, E, Ep, H, csize, cap)
    else:
        Bt = batch_block
    assert B % Bt == 0
    assert Bt == B or Bt % 8 == 0, "partial batch blocks must be sublane aligned"

    est = _vmem_bytes_estimate(Bt, S, E, Ep, H, csize)
    vmem_limit = int(min(max(2 * est, 32 * 1024 * 1024), int(0.9 * cap)))

    flops = (2 * 2 * B * S * E * Ep          # K, V projections
             + 2 * B * E * Ep                # Q projection (last row only)
             + 2 * B * Ep * Ep               # output projection
             + 2 * 2 * B * S * Ep * H)       # score + head-broadcast matmuls
    bytes_accessed = (B * S * E * csize
                      + (3 * E * Ep + Ep * Ep + 2 * Ep * H) * csize
                      + 4 * Ep * 4
                      + B * Ep * 4)
    cost = pl.CostEstimate(flops=flops, transcendentals=B * S * H,
                           bytes_accessed=bytes_accessed)

    kernel = functools.partial(_mha_last_kernel, compute_dtype=compute_dtype)

    out = pl.pallas_call(
        kernel,
        out_shape=jax.ShapeDtypeStruct((B, Ep), jnp.float32),
        grid_spec=pltpu.PrefetchScalarGridSpec(
            num_scalar_prefetch=0,
            grid=(B // Bt,),
            in_specs=[
                pl.BlockSpec((Bt, S, E), lambda i: (i, 0, 0)),   # x
                pl.BlockSpec((E, Ep), lambda i: (0, 0)),         # wq (packed, scaled)
                pl.BlockSpec((1, Ep), lambda i: (0, 0)),         # bq
                pl.BlockSpec((E, Ep), lambda i: (0, 0)),         # wk
                pl.BlockSpec((1, Ep), lambda i: (0, 0)),         # bk
                pl.BlockSpec((E, Ep), lambda i: (0, 0)),         # wv
                pl.BlockSpec((1, Ep), lambda i: (0, 0)),         # bv
                pl.BlockSpec((Ep, H), lambda i: (0, 0)),         # sel
                pl.BlockSpec((H, Ep), lambda i: (0, 0)),         # selT
                pl.BlockSpec((Ep, Ep), lambda i: (0, 0)),        # wo
                pl.BlockSpec((1, Ep), lambda i: (0, 0)),         # bo
            ],
            out_specs=pl.BlockSpec((Bt, Ep), lambda i: (i, 0)),
        ),
        compiler_params=pltpu.CompilerParams(
            dimension_semantics=("parallel",),
            vmem_limit_bytes=vmem_limit,
        ),
        cost_estimate=cost,
    )(x.astype(compute_dtype), wq_p, bq_p, wk_p, bk_p, wv_p, bv_p,
      sel, selT, wo_p, bo_p)

    return out[:, :E] if Ep != E else out


def reference_mha(x, wq, bq, wk, bk, wv, bv, wo, bo):
    """Pure-JAX reference mirroring the PyTorch forward."""
    H, _, Dh = wq.shape
    outs = []
    for h in range(H):
        q = x @ wq[h] + bq[h]                         # [B, S, Dh]
        k = x @ wk[h] + bk[h]
        v = x @ wv[h] + bv[h]
        scores = jnp.einsum('bsd,btd->bst', q, k) / jnp.sqrt(jnp.float32(Dh))
        w = jax.nn.softmax(scores, axis=-1)
        outs.append(jnp.einsum('bst,btd->bsd', w, v))
    concat = jnp.concatenate(outs, axis=-1)           # [B, S, E]
    return (concat @ wo + bo)[:, -1, :]


if __name__ == "__main__":
    B, S, E, H = 2, 8, 32, 4
    Dh = E // H

    key = jax.random.PRNGKey(0)
    ks = jax.random.split(key, 10)

    x = jax.random.normal(ks[0], (B, S, E), dtype=jnp.float32)

    scale_in = 1.0 / sqrt(E)
    wq = jax.random.normal(ks[1], (H, E, Dh), dtype=jnp.float32) * scale_in
    bq = jax.random.normal(ks[2], (H, 1, Dh), dtype=jnp.float32) * 0.1
    wk = jax.random.normal(ks[3], (H, E, Dh), dtype=jnp.float32) * scale_in
    bk = jax.random.normal(ks[4], (H, 1, Dh), dtype=jnp.float32) * 0.1
    wv = jax.random.normal(ks[5], (H, E, Dh), dtype=jnp.float32) * scale_in
    bv = jax.random.normal(ks[6], (H, 1, Dh), dtype=jnp.float32) * 0.1
    wo = jax.random.normal(ks[7], (E, E), dtype=jnp.float32) * scale_in
    bo = jax.random.normal(ks[8], (1, E), dtype=jnp.float32) * 0.1

    ref = reference_mha(x, wq, bq, wk, bk, wv, bv, wo, bo)

    # Default path: bf16 MXU operands with f32 accumulation (v5e/v6e/v7x recipe).
    out_bf16 = multi_head_attention(x, wq, bq, wk, bk, wv, bv, wo, bo)
    out_bf16 = jax.block_until_ready(out_bf16)
    assert out_bf16.shape == (B, E), out_bf16.shape
    assert jnp.allclose(out_bf16, ref, atol=1e-1, rtol=1e-1), \
        f"bf16 max abs diff {jnp.max(jnp.abs(out_bf16 - ref))}"

    # f32 MXU operands (tight numerics check).
    out_f32 = multi_head_attention(x, wq, bq, wk, bk, wv, bv, wo, bo,
                                   compute_dtype=jnp.float32)
    out_f32 = jax.block_until_ready(out_f32)
    assert out_f32.shape == (B, E), out_f32.shape
    assert jnp.allclose(out_f32, ref, atol=2e-3, rtol=2e-3), \
        f"f32 max abs diff {jnp.max(jnp.abs(out_f32 - ref))}"

    print("KERNEL_OK")
</pallas_src>

<mosaic_0001>
module attributes {stable_mosaic.version = 11 : i64} {
  func.func @_mha_last_kernel(%arg0: i32, %arg1: memref<2x8x32xbf16, #tpu.memory_space<vmem>>, %arg2: memref<32x128xbf16, #tpu.memory_space<vmem>>, %arg3: memref<1x128xf32, #tpu.memory_space<vmem>>, %arg4: memref<32x128xbf16, #tpu.memory_space<vmem>>, %arg5: memref<1x128xf32, #tpu.memory_space<vmem>>, %arg6: memref<32x128xbf16, #tpu.memory_space<vmem>>, %arg7: memref<1x128xf32, #tpu.memory_space<vmem>>, %arg8: memref<128x4xbf16, #tpu.memory_space<vmem>>, %arg9: memref<4x128xbf16, #tpu.memory_space<vmem>>, %arg10: memref<128x128xbf16, #tpu.memory_space<vmem>>, %arg11: memref<1x128xf32, #tpu.memory_space<vmem>>, %arg12: memref<2x128xf32, #tpu.memory_space<vmem>>) attributes {dimension_semantics = [#tpu.dimension_semantics<parallel>], iteration_bounds = array<i64: 1>, scalar_prefetch = 0 : i64, scratch_operands = 0 : i64, tpu.core_type = #tpu.core_type<tc>, window_params = [{transform_indices = @transform_0, window_bounds = array<i64: 2, 8, 32>}, {pipeline_mode = #tpu.pipeline_mode<synchronous>, transform_indices = @transform_1, window_bounds = array<i64: 32, 128>}, {pipeline_mode = #tpu.pipeline_mode<synchronous>, transform_indices = @transform_2, window_bounds = array<i64: 1, 128>}, {pipeline_mode = #tpu.pipeline_mode<synchronous>, transform_indices = @transform_3, window_bounds = array<i64: 32, 128>}, {pipeline_mode = #tpu.pipeline_mode<synchronous>, transform_indices = @transform_4, window_bounds = array<i64: 1, 128>}, {pipeline_mode = #tpu.pipeline_mode<synchronous>, transform_indices = @transform_5, window_bounds = array<i64: 32, 128>}, {pipeline_mode = #tpu.pipeline_mode<synchronous>, transform_indices = @transform_6, window_bounds = array<i64: 1, 128>}, {pipeline_mode = #tpu.pipeline_mode<synchronous>, transform_indices = @transform_7, window_bounds = array<i64: 128, 4>}, {pipeline_mode = #tpu.pipeline_mode<synchronous>, transform_indices = @transform_8, window_bounds = array<i64: 4, 128>}, {pipeline_mode = #tpu.pipeline_mode<synchronous>, transform_indices = @transform_9, window_bounds = array<i64: 128, 128>}, {pipeline_mode = #tpu.pipeline_mode<synchronous>, transform_indices = @transform_10, window_bounds = array<i64: 1, 128>}, {transform_indices = @transform_11, window_bounds = array<i64: 2, 128>}]} {
    %c0 = arith.constant 0 : index
    %c0_0 = arith.constant 0 : index
    %c0_1 = arith.constant 0 : index
    %0 = vector.load %arg1[%c0, %c0_0, %c0_1] : memref<2x8x32xbf16, #tpu.memory_space<vmem>>, vector<2x8x32xbf16>
    %1 = vector.shape_cast %0 : vector<2x8x32xbf16> to vector<16x32xbf16>
    %c0_2 = arith.constant 0 : index
    %c0_3 = arith.constant 0 : index
    %2 = vector.load %arg4[%c0_2, %c0_3] : memref<32x128xbf16, #tpu.memory_space<vmem>>, vector<32x128xbf16>
    %cst = arith.constant dense<0.000000e+00> : vector<16x128xf32>
    %3 = tpu.matmul %1, %2, %cst {dimension_numbers = #tpu.dot_dimension_numbers<[1], [0], [0], [1], [0, 0, 1, 1], [], []>} : vector<16x32xbf16>, vector<32x128xbf16>, vector<16x128xf32> -> vector<16x128xf32>
    %c0_4 = arith.constant 0 : index
    %c0_5 = arith.constant 0 : index
    %4 = vector.load %arg5[%c0_4, %c0_5] : memref<1x128xf32, #tpu.memory_space<vmem>>, vector<1x128xf32>
    %5 = vector.broadcast %4 : vector<1x128xf32> to vector<16x128xf32>
    %6 = arith.addf %3, %5 : vector<16x128xf32>
    %c0_6 = arith.constant 0 : index
    %c0_7 = arith.constant 0 : index
    %7 = vector.load %arg6[%c0_6, %c0_7] : memref<32x128xbf16, #tpu.memory_space<vmem>>, vector<32x128xbf16>
    %cst_8 = arith.constant dense<0.000000e+00> : vector<16x128xf32>
    %8 = tpu.matmul %1, %7, %cst_8 {dimension_numbers = #tpu.dot_dimension_numbers<[1], [0], [0], [1], [0, 0, 1, 1], [], []>} : vector<16x32xbf16>, vector<32x128xbf16>, vector<16x128xf32> -> vector<16x128xf32>
    %c0_9 = arith.constant 0 : index
    %c0_10 = arith.constant 0 : index
    %9 = vector.load %arg7[%c0_9, %c0_10] : memref<1x128xf32, #tpu.memory_space<vmem>>, vector<1x128xf32>
    %10 = vector.broadcast %9 : vector<1x128xf32> to vector<16x128xf32>
    %11 = arith.addf %8, %10 : vector<16x128xf32>
    %12 = arith.truncf %6 : vector<16x128xf32> to vector<16x128xbf16>
    %13 = vector.shape_cast %12 : vector<16x128xbf16> to vector<2x8x128xbf16>
    %14 = arith.truncf %11 : vector<16x128xf32> to vector<16x128xbf16>
    %15 = vector.shape_cast %14 : vector<16x128xbf16> to vector<2x8x128xbf16>
    %16 = vector.extract_strided_slice %0 {offsets = [0, 7, 0], sizes = [2, 1, 32], strides = [1, 1, 1]} : vector<2x8x32xbf16> to vector<2x1x32xbf16>
    %17 = vector.shape_cast %16 : vector<2x1x32xbf16> to vector<2x32xbf16>
    %c0_11 = arith.constant 0 : index
    %c0_12 = arith.constant 0 : index
    %18 = vector.load %arg2[%c0_11, %c0_12] : memref<32x128xbf16, #tpu.memory_space<vmem>>, vector<32x128xbf16>
    %cst_13 = arith.constant dense<0.000000e+00> : vector<2x128xf32>
    %19 = tpu.matmul %17, %18, %cst_13 {dimension_numbers = #tpu.dot_dimension_numbers<[1], [0], [0], [1], [0, 0, 1, 1], [], []>} : vector<2x32xbf16>, vector<32x128xbf16>, vector<2x128xf32> -> vector<2x128xf32>
    %c0_14 = arith.constant 0 : index
    %c0_15 = arith.constant 0 : index
    %20 = vector.load %arg3[%c0_14, %c0_15] : memref<1x128xf32, #tpu.memory_space<vmem>>, vector<1x128xf32>
    %21 = vector.broadcast %20 : vector<1x128xf32> to vector<2x128xf32>
    %22 = arith.addf %19, %21 : vector<2x128xf32>
    %23 = arith.truncf %22 : vector<2x128xf32> to vector<2x128xbf16>
    %24 = vector.shape_cast %23 : vector<2x128xbf16> to vector<2x1x128xbf16>
    %25 = vector.broadcast %24 : vector<2x1x128xbf16> to vector<2x8x128xbf16>
    %26 = arith.mulf %25, %13 : vector<2x8x128xbf16>
    %27 = vector.shape_cast %26 : vector<2x8x128xbf16> to vector<16x128xbf16>
    %c0_16 = arith.constant 0 : index
    %c0_17 = arith.constant 0 : index
    %28 = vector.load %arg8[%c0_16, %c0_17] : memref<128x4xbf16, #tpu.memory_space<vmem>>, vector<128x4xbf16>
    %cst_18 = arith.constant dense<0.000000e+00> : vector<16x4xf32>
    %29 = tpu.matmul %27, %28, %cst_18 {dimension_numbers = #tpu.dot_dimension_numbers<[1], [0], [0], [1], [0, 0, 1, 1], [], []>} : vector<16x128xbf16>, vector<128x4xbf16>, vector<16x4xf32> -> vector<16x4xf32>
    %30 = vector.shape_cast %29 : vector<16x4xf32> to vector<2x8x4xf32>
    %cst_19 = arith.constant dense<0xFF800000> : vector<2x4xf32>
    %31 = vector.multi_reduction <maximumf>, %30, %cst_19 [1] : vector<2x8x4xf32> to vector<2x4xf32>
    %32 = vector.shape_cast %31 : vector<2x4xf32> to vector<2x1x4xf32>
    %33 = vector.broadcast %32 : vector<2x1x4xf32> to vector<2x8x4xf32>
    %34 = arith.subf %30, %33 : vector<2x8x4xf32>
    %35 = math.exp %34 : vector<2x8x4xf32>
    %cst_20 = arith.constant dense<0.000000e+00> : vector<2x4xf32>
    %36 = vector.multi_reduction <add>, %35, %cst_20 [1] : vector<2x8x4xf32> to vector<2x4xf32>
    %37 = vector.shape_cast %36 : vector<2x4xf32> to vector<2x1x4xf32>
    %38 = tpu.reciprocal %37 {approx = true} : vector<2x1x4xf32> -> vector<2x1x4xf32>
    %39 = vector.broadcast %38 : vector<2x1x4xf32> to vector<2x8x4xf32>
    %40 = arith.mulf %35, %39 : vector<2x8x4xf32>
    %41 = vector.shape_cast %40 : vector<2x8x4xf32> to vector<16x4xf32>
    %42 = arith.truncf %41 : vector<16x4xf32> to vector<16x4xbf16>
    %c0_21 = arith.constant 0 : index
    %c0_22 = arith.constant 0 : index
    %43 = vector.load %arg9[%c0_21, %c0_22] : memref<4x128xbf16, #tpu.memory_space<vmem>>, vector<4x128xbf16>
    %cst_23 = arith.constant dense<0.000000e+00> : vector<16x128xf32>
    %44 = tpu.matmul %42, %43, %cst_23 {dimension_numbers = #tpu.dot_dimension_numbers<[1], [0], [0], [1], [0, 0, 1, 1], [], []>} : vector<16x4xbf16>, vector<4x128xbf16>, vector<16x128xf32> -> vector<16x128xf32>
    %45 = vector.shape_cast %44 : vector<16x128xf32> to vector<2x8x128xf32>
    %46 = arith.extf %15 : vector<2x8x128xbf16> to vector<2x8x128xf32>
    %47 = arith.mulf %45, %46 : vector<2x8x128xf32>
    %cst_24 = arith.constant dense<0.000000e+00> : vector<2x128xf32>
    %48 = vector.multi_reduction <add>, %47, %cst_24 [1] : vector<2x8x128xf32> to vector<2x128xf32>
    %49 = arith.truncf %48 : vector<2x128xf32> to vector<2x128xbf16>
    %c0_25 = arith.constant 0 : index
    %c0_26 = arith.constant 0 : index
    %50 = vector.load %arg10[%c0_25, %c0_26] : memref<128x128xbf16, #tpu.memory_space<vmem>>, vector<128x128xbf16>
    %cst_27 = arith.constant dense<0.000000e+00> : vector<2x128xf32>
    %51 = tpu.matmul %49, %50, %cst_27 {dimension_numbers = #tpu.dot_dimension_numbers<[1], [0], [0], [1], [0, 0, 1, 1], [], []>} : vector<2x128xbf16>, vector<128x128xbf16>, vector<2x128xf32> -> vector<2x128xf32>
    %c0_28 = arith.constant 0 : index
    %c0_29 = arith.constant 0 : index
    %52 = vector.load %arg11[%c0_28, %c0_29] : memref<1x128xf32, #tpu.memory_space<vmem>>, vector<1x128xf32>
    %53 = vector.broadcast %52 : vector<1x128xf32> to vector<2x128xf32>
    %54 = arith.addf %51, %53 : vector<2x128xf32>
    %c0_30 = arith.constant 0 : index
    %c0_31 = arith.constant 0 : index
    %55 = vector.load %arg12[%c0_30, %c0_31] : memref<2x128xf32, #tpu.memory_space<vmem>>, vector<2x128xf32>
    tpu.vector_store %arg12[%c0_30, %c0_31], %54 {strides = array<i32>} : memref<2x128xf32, #tpu.memory_space<vmem>>, vector<2x128xf32>,
    return
  }
  func.func @transform_0(%arg0: i32) -> (i32, i32, i32) {
    %c0_i32 = arith.constant 0 : i32
    %c0_i32_0 = arith.constant 0 : i32
    %c0_i32_1 = arith.constant 0 : i32
    return %arg0, %c0_i32, %c0_i32_0 : i32, i32, i32
  }
  func.func @transform_1(%arg0: i32) -> (i32, i32) {
    %c0_i32 = arith.constant 0 : i32
    %c0_i32_0 = arith.constant 0 : i32
    %c0_i32_1 = arith.constant 0 : i32
    return %c0_i32, %c0_i32_0 : i32, i32
  }
  func.func @transform_2(%arg0: i32) -> (i32, i32) {
    %c0_i32 = arith.constant 0 : i32
    %c0_i32_0 = arith.constant 0 : i32
    %c0_i32_1 = arith.constant 0 : i32
    return %c0_i32, %c0_i32_0 : i32, i32
  }
  func.func @transform_3(%arg0: i32) -> (i32, i32) {
    %c0_i32 = arith.constant 0 : i32
    %c0_i32_0 = arith.constant 0 : i32
    %c0_i32_1 = arith.constant 0 : i32
    return %c0_i32, %c0_i32_0 : i32, i32
  }
  func.func @transform_4(%arg0: i32) -> (i32, i32) {
    %c0_i32 = arith.constant 0 : i32
    %c0_i32_0 = arith.constant 0 : i32
    %c0_i32_1 = arith.constant 0 : i32
    return %c0_i32, %c0_i32_0 : i32, i32
  }
  func.func @transform_5(%arg0: i32) -> (i32, i32) {
    %c0_i32 = arith.constant 0 : i32
    %c0_i32_0 = arith.constant 0 : i32
    %c0_i32_1 = arith.constant 0 : i32
    return %c0_i32, %c0_i32_0 : i32, i32
  }
  func.func @transform_6(%arg0: i32) -> (i32, i32) {
    %c0_i32 = arith.constant 0 : i32
    %c0_i32_0 = arith.constant 0 : i32
    %c0_i32_1 = arith.constant 0 : i32
    return %c0_i32, %c0_i32_0 : i32, i32
  }
  func.func @transform_7(%arg0: i32) -> (i32, i32) {
    %c0_i32 = arith.constant 0 : i32
    %c0_i32_0 = arith.constant 0 : i32
    %c0_i32_1 = arith.constant 0 : i32
    return %c0_i32, %c0_i32_0 : i32, i32
  }
  func.func @transform_8(%arg0: i32) -> (i32, i32) {
    %c0_i32 = arith.constant 0 : i32
    %c0_i32_0 = arith.constant 0 : i32
    %c0_i32_1 = arith.constant 0 : i32
    return %c0_i32, %c0_i32_0 : i32, i32
  }
  func.func @transform_9(%arg0: i32) -> (i32, i32) {
    %c0_i32 = arith.constant 0 : i32
    %c0_i32_0 = arith.constant 0 : i32
    %c0_i32_1 = arith.constant 0 : i32
    return %c0_i32, %c0_i32_0 : i32, i32
  }
  func.func @transform_10(%arg0: i32) -> (i32, i32) {
    %c0_i32 = arith.constant 0 : i32
    %c0_i32_0 = arith.constant 0 : i32
    %c0_i32_1 = arith.constant 0 : i32
    return %c0_i32, %c0_i32_0 : i32, i32
  }
  func.func @transform_11(%arg0: i32) -> (i32, i32) {
    %c0_i32 = arith.constant 0 : i32
    %c0_i32_0 = arith.constant 0 : i32
    return %arg0, %c0_i32 : i32, i32
  }
}

</mosaic_0001>

<bundles_post_ra>
// kernel: tpu_custom_call.1
= control target key start
LH: loop header
LB: loop body
LE: loop exit
PB: predicated region body
PF: predicated region fallthrough
CT: control target
= control target key end

     0   :  { %16 = vsyncpa [#allocation3], 0  ;;  %s1231_s0 = inlined_call_operand.hbm [shape: bf16[2,8,32], index: 0, kind: input, shape index: {}]   ;;  %s1232_s1 = inlined_call_operand.vmem [shape: bf16[32,128], index: 1, kind: input, shape index: {}]   ;;  %s1233_s2 = inlined_call_operand.vmem [shape: f32[1,128], index: 2, kind: input, shape index: {}]   ;;  %s1234_s3 = inlined_call_operand.vmem [shape: bf16[32,128], index: 3, kind: input, shape index: {}]   ;;  %s1235_s4 = inlined_call_operand.vmem [shape: f32[1,128], index: 4, kind: input, shape index: {}]   ;;  %s1236_s5 = inlined_call_operand.hbm [shape: bf16[32,128], index: 5, kind: input, shape index: {}]   ;;  %s1237_s6 = inlined_call_operand.hbm [shape: f32[1,128], index: 6, kind: input, shape index: {}]   ;;  %s1238_s7 = inlined_call_operand.vmem [shape: bf16[128,4], index: 7, kind: input, shape index: {}]   ;;  %s1239_s8 = inlined_call_operand.vmem [shape: bf16[4,128], index: 8, kind: input, shape index: {}]   ;;  %s1240_s9 = inlined_call_operand.vmem [shape: bf16[128,128], index: 9, kind: input, shape index: {}]   ;;  %s1241_s10 = inlined_call_operand.vmem [shape: f32[1,128], index: 10, kind: input, shape index: {}]   ;;  %s1242_s11 = inlined_call_operand.hbm [shape: f32[2,128], index: 11, kind: output, shape index: {}]  }
   0x1   :  { %17 = vsyncpa [#allocation6], 0 }
   0x2   :  { %18 = vsyncpa [#allocation4], 0  ;;  %s984_s17 = smov [#allocation5]   ;;  %s985_s19 = smov [#allocation2]  }
   0x3   :  { %s44_s18 = sshll.u32 %s984_s17, 4  ;;  %s24_s20 = sshll.u32 %s985_s19, 4  ;;  %s45_s18 = int_to_ptr.vmem [resolvable:$true] %s44_s18  ;;  %s1053_s20 = int_to_ptr.vmem [resolvable:$true] %s24_s20 }
   0x4   :  { %s890_s23 = scalar_lea.hbm %s1236_s5, 256 }
   0x5   :  { %p891_p0 = scmp.ne.s32.totalorder %s1236_s5, %s890_s23  ;;  %p894_p1 = scmp.lt.u32.totalorder %s890_s23, %s1236_s5 }
   0x7   :  { %p896_p2 = pnand %p894_p1, %p891_p0 }
   0x9   :  { %899 = shalt.err (!%p896_p2)
}
   0xa   :  { %s900_s28 = scalar_lea.vmem %s45_s18, 256  ;;  %p905_p4 = scmp.lt.s32.totalorder %s45_s18, %s45_s18 }
   0xb   :  { %p901_p3 = scmp.ne.s32.totalorder %s45_s18, %s900_s28  ;;  %p906_p5 = scmp.lt.s32.totalorder %s900_s28, %s900_s28 }
   0xd   :  { %p907_p6 = por %p906_p5, %p905_p4 }
   0xf   :  { %p908_p7 = pnand %p907_p6, %p901_p3 }
  0x11   :  { %911 = shalt.err (!%p908_p7)
}
  0x12   :  { %s986_s29 = smov 64   ;;  %s987_s30 = smov 4  }
  0x13   :  { %50 = dma.hbm_to_vmem [thread:$0]  %s1236_s5, 256, %s45_s18, [#allocation6], %s986_s29, %s986_s29, %s987_s30  }
  0x14   :  { %s912_s16 = scalar_lea.hbm %s1231_s0, 128 }
  0x15   :  { %p913_p8 = scmp.ne.s32.totalorder %s1231_s0, %s912_s16  ;;  %p916_p9 = scmp.lt.u32.totalorder %s912_s16, %s1231_s0 }
  0x17   :  { %p918_p10 = pnand %p916_p9, %p913_p8 }
  0x19   :  { %921 = shalt.err (!%p918_p10)
}
  0x1a   :  { %s922_s23 = scalar_lea.vmem %s1053_s20, 128  ;;  %p927_p12 = scmp.lt.s32.totalorder %s1053_s20, %s1053_s20 }
  0x1b   :  { %p923_p11 = scmp.ne.s32.totalorder %s1053_s20, %s922_s23  ;;  %p928_p13 = scmp.lt.s32.totalorder %s922_s23, %s922_s23 }
  0x1d   :  { %p929_p0 = por %p928_p13, %p927_p12 }
  0x1f   :  { %p930_p1 = pnand %p929_p0, %p923_p11 }
  0x21   :  { %933 = shalt.err (!%p930_p1)
}
  0x22   :  { %30 = dma.hbm_to_vmem [thread:$0]  %s1231_s0, 128, %s1053_s20, [#allocation3], %s986_s29, %s986_s29, %s987_s30  }
  0x23   :  { %s988_s24 = smov [#allocation7]   ;;  %s934_s28 = scalar_lea.hbm %s1237_s6, 16 }
  0x24   :  { %s57_s25 = sshll.u32 %s988_s24, 4  ;;  %p935_p2 = scmp.ne.s32.totalorder %s1237_s6, %s934_s28  ;;  %s58_s25 = int_to_ptr.vmem [resolvable:$true] %s57_s25 }
  0x25   :  { %p938_p3 = scmp.lt.u32.totalorder %s934_s28, %s1237_s6 }
  0x27   :  { %p940_p4 = pnand %p938_p3, %p935_p2 }
  0x29   :  { %943 = shalt.err (!%p940_p4)
}
  0x2a   :  { %s944_s16 = scalar_lea.vmem %s58_s25, 16  ;;  %s948_s0 = scalar_lea.vmem %s58_s25, 32 }
  0x2b   :  { %p945_p5 = scmp.ne.s32.totalorder %s58_s25, %s944_s16  ;;  %p949_p6 = scmp.lt.s32.totalorder %s58_s25, %s58_s25 }
  0x2c   :  { %p950_p7 = scmp.lt.s32.totalorder %s948_s0, %s944_s16 }
  0x2e   :  { %p951_p8 = por %p950_p7, %p949_p6 }
  0x30   :  { %p952_p9 = pnand %p951_p8, %p945_p5 }
  0x32   :  { %955 = shalt.err (!%p952_p9)
}
  0x33   :  { %60 = dma.hbm_to_vmem [thread:$0]  %s1237_s6, 16, %s58_s25, [#allocation6]  }
  0x34   :  { %978 = dma.done.wait [#allocation3], 128  }
  0x35   :  { %979 = vsyncadd [#allocation3], 4294967168 }
  0x36   :  { %980 = dma.done.wait [#allocation6], 272  }
  0x37   :  { %981 = vsyncadd [#allocation6], 4294967024  ;;  %v989_v0 = vmov 0.0   ;;  %vm990_vm0 = vmmov 0   ;;  %v857_v1 = vld [vmem:[%s1232_s1] sm:$0xff]   ;;  %v858_v2 = vld [vmem:[%s1232_s1 + $0x8] sm:$0xff]   ;;  %v314_v28 = vlaneseq }
  0x38   :  { %794 = vmatprep.subr.bf16.mxu0 %v989_v0  ;;  %798 = vmatprep.mubr.msk.bf16.mxu0 %vm990_vm0, %v989_v0  ;;  %v79_v3 = vld [vmem:[#allocation2] sm:$0xf]  ;;  %v80_v4 = vld [vmem:[#allocation2 + $0x4] sm:$0xf]  ;;  %v862_v10 = vld [vmem:[%s1234_s3 + $0x8] sm:$0xff]   ;;  %vm251_vm1 = vcmask 1041409  }
  0x39   :  { %778 = vmatprep.subr.bf16.mxu1 %v989_v0  ;;  %782 = vmatprep.mubr.msk.bf16.mxu1 %vm990_vm0, %v989_v0  ;;  %v720_v5 = vcombine.low %v79_v3, %v79_v3  ;;  %v721_v6 = vcombine.low %v80_v4, %v80_v4  ;;  %v861_v7 = vld [vmem:[%s1234_s3] sm:$0xff]   ;;  %vm109_vm2 = vcmask 261120   ;;  %v707_v13 = vcombine.low %v79_v3, %v80_v4  ;;  %v864_v14 = vld [vmem:[#allocation5] sm:$0xff]   ;;  %v865_v17 = vld [vmem:[#allocation5 + $0x8] sm:$0xff]   ;;  %s992_s15 = smov [#allocation8]  }
  0x3a   :  { %795 = vmatpush3.bf16.msra.mxu0 %v857_v1  ;;  %779 = vmatpush3.bf16.msra.mxu1 %v861_v7  ;;  %v866_v18 = vld [vmem:[%s1238_s7] sm:$0xff]   ;;  %v867_v19 = vld [vmem:[%s1238_s7 + $0x8] sm:$0xff]   ;;  %v868_v20 = vld [vmem:[%s1238_s7 + $0x10] sm:$0xff]   ;;  %v991_v26 = vmov 1966171168   ;;  %v315_v30 = vshrl.u32 %v314_v28, 7 }
  0x3b   :  { %796 = vmatprep.subr.bf16.mxu0 %v989_v0  ;;  %v247_v8 = vunpack.c.l.b16 %v720_v5  ;;  %v248_v9 = vunpack.c.l.b16 %v721_v6  ;;  %780 = vmatprep.subr.bf16.mxu1 %v989_v0  ;;  %v869_v21 = vld [vmem:[%s1238_s7 + $0x18] sm:$0xff]   ;;  %v870_v22 = vld [vmem:[%s1238_s7 + $0x20] sm:$0xff]   ;;  %v871_v23 = vld [vmem:[%s1238_s7 + $0x28] sm:$0xff]   ;;  %v312_v27 = vunpack.c.l.s4 %v991_v26  ;;  %vm508_vm3 = vcmask 1041408   ;;  %s696_s16 = sshll.u32 %s992_s15, 4  ;;  %s697_s16 = int_to_ptr.vmem [resolvable:$true] %s696_s16 }
  0x3c   :  { %v872_v24 = vld [vmem:[%s1238_s7 + $0x30] sm:$0xff]   ;;  %v873_v25 = vld [vmem:[%s1238_s7 + $0x38] sm:$0xff]   ;;  %v719_v31 = vld [vmem:[%s1233_s2] ss:$0 sm:$0xff]  ;;  %v331_v46 = vsub.s32 0, %v315_v30  ;;  %vm464_vm4 = vcmask 31744   ;;  %p961_p11 = scmp.lt.s32.totalorder %s697_s16, %s697_s16 }
  0x3d   :  { %v249_v11 = vrot.slane %v247_v8, 7  ;;  %v250_v12 = vrot.slane %v248_v9, 6  ;;  %v313_v29 = vunpack.c.0.s8 %v312_v27  ;;  %v706_v44 = vld [vmem:[%s1235_s4] ss:$0 sm:$0xff]  ;;  %s956_s0 = scalar_lea.vmem %s697_s16, 32 }
  0x3e   :  { %797 = vmatpush3.bf16.msra.mxu0 %v858_v2  ;;  %781 = vmatpush3.bf16.msra.mxu1 %v862_v10  ;;  %v504_v4 = vld [vmem:[%s1239_s8] sm:$0x3]  ;;  %p957_p10 = scmp.ne.s32.totalorder %s697_s16, %s956_s0  ;;  %p962_p12 = scmp.lt.s32.totalorder %s956_s0, %s956_s0 }
  0x3f   :  { %822 = vmatprep.subr.bf16.mxu0 %v989_v0  ;;  %v252_v15 = vsel %vm251_vm1, %v250_v12, %v249_v11  ;;  %786 = vmatprep.subr.bf16.mxu1 %v989_v0  ;;  %v316_v35 = vsub.s32 %v313_v29, %v315_v30  ;;  %v510_v5 = vsel %vm508_vm3, %v504_v4, 0 }
  0x40   :  { %v253_v16 = vpack.c.b16 %v252_v15, %v252_v15  ;;  %p963_p13 = por %p962_p12, %p961_p11 }
  0x41   :  { %783 = vmatmul.mubr.msk.bf16.vlgmr.msra.gmra.mrb[0].mxu1 %vm109_vm2, %v707_v13 }
  0x42   :  { %799 = vmatmul.mubr.msk.bf16.vlgmr.msra.gmra.mrb[0].mxu0 %vm109_vm2, %v253_v16  ;;  %787 = vmatpush3.bf16.msra.mxu1 %v864_v14  ;;  %p964_p0 = pnand %p963_p13, %p957_p10 }
  0x43   :  { %790 = vmatprep.mubr.msk.bf16.mxu1 %vm990_vm0, %v989_v0  ;;  %788 = vmatprep.subr.bf16.mxu1 %v989_v0 }
  0x44   :  { %824 = vmatprep.mubr.msk.bf16.mxu0 %vm990_vm0, %v989_v0  ;;  %823 = vmatpush3.bf16.msra.mxu0 %v510_v5 }
  0x45   :  { %828 = vmatprep.subr.bf16.mxu0 %v989_v0 }
  0x46   :  { %789 = vmatpush3.bf16.msra.mxu1 %v865_v17 }
  0x47   :  { %802 = vmatprep.subr.bf16.mxu1 %v989_v0 }
  0x49   :  { %791 = vmatmul.mubr.msk.bf16.vlgmr.msra.gmra.mrb[4].mxu1 %vm109_vm2, %v707_v13 }
  0x4a   :  { %803 = vmatpush3.bf16.msra.mxu1 %v866_v18  ;;  %818 = vmatprep.mubr.msk.bf16.mxu1 %vm990_vm0, %v989_v0 }
  0x4b   :  { %804 = vmatprep.subr.bf16.mxu1 %v989_v0 }
  0x4e   :  { %805 = vmatpush3.bf16.msra.mxu1 %v867_v19 }
  0x4f   :  { %806 = vmatprep.subr.bf16.mxu1 %v989_v0 }
  0x52   :  { %807 = vmatpush3.bf16.msra.mxu1 %v868_v20 }
  0x53   :  { %808 = vmatprep.subr.bf16.mxu1 %v989_v0 }
  0x56   :  { %809 = vmatpush3.bf16.msra.mxu1 %v869_v21 }
  0x57   :  { %810 = vmatprep.subr.bf16.mxu1 %v989_v0 }
  0x5a   :  { %811 = vmatpush3.bf16.msra.mxu1 %v870_v22 }
  0x5b   :  { %812 = vmatprep.subr.bf16.mxu1 %v989_v0 }
  0x5e   :  { %813 = vmatpush3.bf16.msra.mxu1 %v871_v23 }
  0x5f   :  { %814 = vmatprep.subr.bf16.mxu1 %v989_v0 }
  0x62   :  { %815 = vmatpush3.bf16.msra.mxu1 %v872_v24 }
  0x63   :  { %816 = vmatprep.subr.bf16.mxu1 %v989_v0 }
  0x66   :  { %817 = vmatpush3.bf16.msra.mxu1 %v873_v25 }
 0x114   :  { %v147_v33 = vpop.f32.mrb[0].mxu1 }
 0x115   :  { %v303_v32 = vpop.f32.mrb[0].mxu0  ;;  %v784_v37 = vpop.f32.mrb[1].mxu1  ;;  %v148_v50 = vadd.f32 %v706_v44, %v147_v33 }
 0x116   :  { %v304_v34 = vadd.f32 %v719_v31, %v303_v32  ;;  %v800_v36 = vpop.f32.mrb[1].mxu0  ;;  %v150_v39 = vpop.f32.mrb[2].mxu1 }
 0x117   :  { %v306_v38 = vpop.f32.mrb[2].mxu0  ;;  %v785_v42 = vpop.f32.mrb[3].mxu1  ;;  %v745_v56 = vpack.c.bf16 %v148_v50, %v148_v50  ;;  %v151_v58 = vadd.f32 %v706_v44, %v150_v39 }
 0x118   :  { %v309_v40 = vpack.c.bf16 %v304_v34, %v304_v34  ;;  %v801_v41 = vpop.f32.mrb[3].mxu0 }
 0x119   :  { %v746_v63 = vpack.c.bf16 %v151_v58, %v151_v58  ;;  %v881_v58 = vld [vmem:[%s1240_s9 + $0x38] sm:$0xff]  }
 0x11a   :  { %v317_v43 = vrot.slane %v309_v40, %v316_v35 }
 0x11c   :  { %v324_v45 = vrot.slane %v317_v43, %v316_v35  ;;  %v1167_v47 = vpop.f32.mrb[4].mxu1 }
 0x11d   :  { %v792_v51 = vpop.f32.mrb[5].mxu1 }
 0x11e   :  { %v326_v48 = vunpack.i.h.s16 %v324_v45  ;;  %v725_v49 = vpack.i.b16 %v324_v45, %v324_v45  ;;  %v1169_v52 = vpop.f32.mrb[6].mxu1  ;;  %v875_v51 = vld [vmem:[%s1240_s9 + $0x8] sm:$0xff]  }
 0x11f   :  { %v793_v55 = vpop.f32.mrb[7].mxu1 }
 0x120   :  { %v328_v53 = vpack.i.b16 %v326_v48, %v326_v48  ;;  %v332_v54 = vrot.slane %v725_v49, %v331_v46  ;;  %v874_v49 = vld [vmem:[%s1240_s9] sm:$0xff]  }
 0x121   :  { %v878_v55 = vld [vmem:[%s1240_s9 + $0x20] sm:$0xff]  }
 0x122   :  { %v338_v57 = vpack.i.b16 %v332_v54, %v332_v54  ;;  %v336_v59 = vrot.slane %v328_v53, %v331_v46  ;;  %v876_v53 = vld [vmem:[%s1240_s9 + $0x10] sm:$0xff]   ;;  %v877_v54 = vld [vmem:[%s1240_s9 + $0x18] sm:$0xff]  }
 0x124   :  { %v343_v60 = vrot.slane %v338_v57, %v331_v46  ;;  %v345_v61 = vpack.i.b16 %v336_v59, %v336_v59  ;;  %v880_v57 = vld [vmem:[%s1240_s9 + $0x30] sm:$0xff]   ;;  %v711_v59 = vld [vmem:[#allocation7] ss:$0 sm:$0xff] }
 0x126   :  { %v351_v62 = vmul.bf16 %v745_v56, %v343_v60  ;;  %v350_v1 = vrot.slane %v345_v61, %v331_v46  ;;  %v879_v56 = vld [vmem:[%s1240_s9 + $0x28] sm:$0xff]   ;;  %v212_v60 = vadd.f32 %v711_v59, %v1167_v47  ;;  %v215_v61 = vadd.f32 %v711_v59, %v1169_v52 }
 0x128   :  { %v352_v2 = vmul.bf16 %v746_v63, %v350_v1  ;;  %v748_v63 = vpack.c.bf16 %v215_v61, %v215_v61 }
 0x12a   :  { %v726_v3 = vcombine.low %v351_v62, %v352_v2  ;;  %v747_v62 = vpack.c.bf16 %v212_v60, %v212_v60 }
 0x12c   :  { %819 = vmatmul.mubr.bf16.vlgmr.msra.gmra.mrb[8].mxu1 %v726_v3  ;;  %v553_v1 = vunpack.c.l.bf16 %v747_v62  ;;  %v554_v3 = vunpack.c.l.bf16 %v748_v63 }
 0x1ff   :  { %v457_v6 = vpop.f32.mrb[8].mxu1 }
 0x200   :  { %v465_v7 = vsel %vm464_vm4, %v457_v6, -inf  ;;  %v820_v8 = vpop.f32.mrb[9].mxu1 }
 0x201   :  { %v466_v9 = vrot.slane %v465_v7, 4  ;;  %v460_v10 = vpop.f32.mrb[10].mxu1 }
 0x202   :  { %v472_v11 = vsel %vm464_vm4, %v460_v10, -inf  ;;  %v821_v12 = vpop.f32.mrb[11].mxu1 }
 0x203   :  { %v467_v13 = vmax.f32 %v465_v7, %v466_v9  ;;  %v473_v14 = vrot.slane %v472_v11, 4 }
 0x205   :  { %v468_v15 = vrot.slane %v467_v13, 2  ;;  %v474_v16 = vmax.f32 %v472_v11, %v473_v14 }
 0x207   :  { %v469_v17 = vmax.f32 %v467_v13, %v468_v15  ;;  %v475_v18 = vrot.slane %v474_v16, 2 }
 0x209   :  { %v470_v19 = vrot.slane %v469_v17, 1  ;;  %v476_v20 = vmax.f32 %v474_v16, %v475_v18 }
 0x20b   :  { %v471_v21 = vmax.f32 %v469_v17, %v470_v19  ;;  %v477_v22 = vrot.slane %v476_v20, 1 }
 0x20d   :  { %v479_v23 = vsub.f32 %v457_v6, %v471_v21  ;;  %v478_v24 = vmax.f32 %v476_v20, %v477_v22 }
 0x20f   :  { %v481_v25 = vmul.f32 1.442695, %v479_v23  ;;  %v480_v26 = vsub.f32 %v460_v10, %v478_v24  ;;  %v736_v24 = vld [vmem:[%s1241_s10] ss:$0 sm:$0xff] }
 0x211   :  { %882 = vpow2.f32 %v481_v25  ;;  %v483_v27 = vmul.f32 1.442695, %v480_v26 }
 0x213   :  { %884 = vpow2.f32 %v483_v27 }
 0x21b   :  { %v883_v28 = vpop.eup %882 }
 0x21c   :  { %v485_v29 = vsel %vm464_vm4, %v883_v28, 0.0 }
 0x21d   :  { %v885_v30 = vpop.eup %884  ;;  %v486_v31 = vrot.slane %v485_v29, 4 }
 0x21e   :  { %v492_v32 = vsel %vm464_vm4, %v885_v30, 0.0 }
 0x21f   :  { %v487_v33 = vadd.f32 %v486_v31, %v485_v29  ;;  %v493_v34 = vrot.slane %v492_v32, 4 }
 0x221   :  { %v488_v35 = vrot.slane %v487_v33, 2  ;;  %v494_v36 = vadd.f32 %v493_v34, %v492_v32 }
 0x223   :  { %v489_v37 = vadd.f32 %v488_v35, %v487_v33  ;;  %v495_v38 = vrot.slane %v494_v36, 2 }
 0x225   :  { %v490_v39 = vrot.slane %v489_v37, 1  ;;  %v496_v40 = vadd.f32 %v495_v38, %v494_v36 }
 0x227   :  { %v491_v41 = vadd.f32 %v490_v39, %v489_v37  ;;  %v497_v42 = vrot.slane %v496_v40, 1 }
 0x229   :  { %886 = vrcp.f32 %v491_v41  ;;  %v498_v43 = vadd.f32 %v497_v42, %v496_v40 }
 0x22b   :  { %888 = vrcp.f32 %v498_v43 }
 0x233   :  { %v887_v44 = vpop.eup %886 }
 0x234   :  { %v501_v46 = vmul.f32 %v887_v44, %v883_v28 }
 0x235   :  { %v889_v45 = vpop.eup %888 }
 0x236   :  { %v502_v48 = vmul.f32 %v889_v45, %v885_v30 }
 0x238   :  { %v503_v50 = vpack.c.bf16 %v502_v48, %v501_v46 }
 0x23a   :  { %825 = vmatmul.mubr.msk.bf16.vlgmr.msra.gmra.mrb[4].mxu0 %vm464_vm4, %v503_v50 }
 0x23b   :  { %829 = vmatpush3.bf16.msra.mxu0 %v874_v49  ;;  %844 = vmatprep.mubr.msk.bf16.mxu0 %vm990_vm0, %v989_v0 }
 0x23c   :  { %830 = vmatprep.subr.bf16.mxu0 %v989_v0 }
 0x23f   :  { %831 = vmatpush3.bf16.msra.mxu0 %v875_v51 }
 0x240   :  { %832 = vmatprep.subr.bf16.mxu0 %v989_v0 }
 0x243   :  { %833 = vmatpush3.bf16.msra.mxu0 %v876_v53 }
 0x244   :  { %834 = vmatprep.subr.bf16.mxu0 %v989_v0 }
 0x247   :  { %835 = vmatpush3.bf16.msra.mxu0 %v877_v54 }
 0x248   :  { %836 = vmatprep.subr.bf16.mxu0 %v989_v0 }
 0x24b   :  { %837 = vmatpush3.bf16.msra.mxu0 %v878_v55 }
 0x24c   :  { %838 = vmatprep.subr.bf16.mxu0 %v989_v0 }
 0x24f   :  { %839 = vmatpush3.bf16.msra.mxu0 %v879_v56 }
 0x250   :  { %840 = vmatprep.subr.bf16.mxu0 %v989_v0 }
 0x253   :  { %841 = vmatpush3.bf16.msra.mxu0 %v880_v57 }
 0x254   :  { %842 = vmatprep.subr.bf16.mxu0 %v989_v0 }
 0x257   :  { %843 = vmatpush3.bf16.msra.mxu0 %v881_v58 }
 0x30d   :  { %v546_v2 = vpop.f32.mrb[4].mxu0 }
 0x30e   :  { %v555_v4 = vmul.f32 %v553_v1, %v546_v2  ;;  %v826_v5 = vpop.f32.mrb[5].mxu0 }
 0x30f   :  { %v549_v6 = vpop.f32.mrb[6].mxu0 }
 0x310   :  { %v557_v7 = vrot.slane %v555_v4, 4  ;;  %v556_v0 = vmul.f32 %v554_v3, %v549_v6  ;;  %v827_v8 = vpop.f32.mrb[7].mxu0 }
 0x312   :  { %v558_v9 = vadd.f32 %v557_v7, %v555_v4  ;;  %v563_v10 = vrot.slane %v556_v0, 4 }
 0x314   :  { %v559_v11 = vrot.slane %v558_v9, 2  ;;  %v564_v12 = vadd.f32 %v563_v10, %v556_v0 }
 0x316   :  { %v560_v13 = vadd.f32 %v559_v11, %v558_v9  ;;  %v565_v14 = vrot.slane %v564_v12, 2 }
 0x318   :  { %v561_v47 = vrot.slane %v560_v13, 1  ;;  %v566_v15 = vadd.f32 %v565_v14, %v564_v12 }
 0x31a   :  { %v562_v52 = vadd.f32 %v561_v47, %v560_v13  ;;  %v567_v16 = vrot.slane %v566_v15, 1 }
 0x31c   :  { %v569_v17 = vpack.c.bf16 %v562_v52, %v562_v52  ;;  %v568_v18 = vadd.f32 %v567_v16, %v566_v15 }
 0x31e   :  { %v570_v19 = vpack.c.bf16 %v568_v18, %v568_v18  ;;  %v596_v20 = vunpack.c.l.b16 %v569_v17 }
 0x320   :  { %v597_v21 = vunpack.c.l.b16 %v570_v19 }
 0x322   :  { %v598_v22 = vsel %vm251_vm1, %v597_v21, %v596_v20 }
 0x323   :  { %v599_v23 = vpack.c.b16 %v598_v22, %v598_v22 }
 0x325   :  { %845 = vmatmul.mubr.bf16.vlgmr.msra.gmra.mrb[8].mxu0 %v599_v23 }
 0x3f8   :  { %v683_v25 = vpop.f32.mrb[8].mxu0 }
 0x3f9   :  { %v684_v26 = vadd.f32 %v736_v24, %v683_v25  ;;  %v846_v27 = vpop.f32.mrb[9].mxu0 }
 0x3fa   :  { %v686_v28 = vpop.f32.mrb[10].mxu0 }
 0x3fb   :  { %689 = vst [vmem:[#allocation8] sm:$0x3] %v684_v26  ;;  %v847_v29 = vpop.f32.mrb[11].mxu0 }
 0x3fc   :  { %967 = shalt.err (!%p964_p0)
}
 0x3fd   :  { %s968_s10 = scalar_lea.hbm %s1242_s11, 32 }
 0x3fe   :  { %p969_p1 = scmp.ne.s32.totalorder %s1242_s11, %s968_s10  ;;  %p972_p2 = scmp.lt.u32.totalorder %s968_s10, %s1242_s11 }
 0x400   :  { %p974_p3 = pnand %p972_p2, %p969_p1 }
 0x402   :  { %977 = shalt.err (!%p974_p3)
}
 0x403   :  { %699 = dma.vmem_to_hbm [thread:$0]  %s697_s16, 32, %s1242_s11, [#allocation4]  }
 0x404   :  { %982 = dma.done.wait [#allocation4], 32  }
 0x405   :  { %983 = vsyncadd [#allocation4], 4294967264 }
 0x406   :  { %703 = vsyncpa [#allocation3], 1 }
 0x407   :  { %704 = vsyncpa [#allocation6], 1 }
 0x408   :  { %705 = vsyncpa [#allocation4], 1 }

</bundles_post_ra>
